<compile_context>
chip_gen: v6e
topology: v6e:2x2x1
jax: 0.10.0
libtpu: 0.0.40
codegen_flags: <defaults>
</compile_context>

<pallas_src>
import jax
import jax.numpy as jnp
from jax import lax
from jax.experimental import pallas as pl
from jax.experimental.pallas import tpu as pltpu


def _dominant_kernel(x_ref, a_ref, w1_ref, b1_ref, w2_ref, b2_ref,
                     rec_a_ref, rec_real_ref, h_ref):
    # x_ref:        (Bt, V, F)  batch slice for this grid step
    # a_ref:        (V, V)      adjacency (grid-invariant)
    # w1_ref:       (F, H1), b1_ref: (1, H1)   encoder Conv1d(k=1) params
    # w2_ref:       (H1, F), b2_ref: (1, F)    decoder Conv1d(k=1) params
    # rec_a_ref:    (Bt, V, V)
    # rec_real_ref: (Bt, V, F)
    # h_ref:        (Bt*V, H1)  VMEM scratch holding the embedding H
    Bt, V, F = x_ref.shape
    cdt = a_ref.dtype                      # MXU operand dtype (f32 or bf16)
    adj = a_ref[...]                       # (V, V)

    # --- encoder per-node linear (Conv1d k=1), folded over the Bt batches ---
    # (Bt, V, F) -> (Bt*V, F): merges leading dims only (layout-free reshape).
    x_all = x_ref[...].reshape(Bt * V, F)
    seq_all = jnp.dot(x_all, w1_ref[...],
                      preferred_element_type=jnp.float32) + b1_ref[...]  # f32

    # --- graph propagation A @ (.) + Tanh, then rec_A = H @ H^T, per batch ---
    for b in range(Bt):
        seq_b = seq_all[b * V:(b + 1) * V, :].astype(cdt)                # (V, H1)
        h_b = jnp.tanh(jnp.dot(adj, seq_b,
                               preferred_element_type=jnp.float32))      # (V, H1) f32
        h_b_c = h_b.astype(cdt)
        h_ref[b * V:(b + 1) * V, :] = h_b_c
        # H @ H^T without materializing a transpose: contract last axes.
        rec_a_ref[b] = lax.dot_general(
            h_b_c, h_b_c, (((1,), (1,)), ((), ())),
            preferred_element_type=jnp.float32).astype(rec_a_ref.dtype)

    # --- decoder per-node linear, folded over the Bt batches ---
    h_all = h_ref[...]                     # (Bt*V, H1) in compute dtype
    dec_all = jnp.dot(h_all, w2_ref[...],
                      preferred_element_type=jnp.float32) + b2_ref[...]  # (Bt*V, F) f32

    for b in range(Bt):
        dec_b = dec_all[b * V:(b + 1) * V, :].astype(cdt)
        rec_real_ref[b] = jnp.tanh(
            jnp.dot(adj, dec_b, preferred_element_type=jnp.float32)
        ).astype(rec_real_ref.dtype)


def dominant_forward(data, A, w1, b1, w2, b2, *,
                     compute_dtype=jnp.float32, batches_per_step=None):
    """data: (B, T, V, F), A: (V, V). Returns (rec_A (B,V,V), rec_real (B,V,F))."""
    x = data[:, -1]                        # (B, V, F) — glue in plain JAX
    B, V, F = x.shape
    H1 = w1.shape[1]

    # Batches per grid step: fold batches into bigger matmuls, but keep >= 2
    # grid steps when possible so v7x's two TensorCores both get a "parallel"
    # step; v5e/v6e (single TC) are indifferent to the split.
    if batches_per_step is None:
        n_steps = 2 if (B >= 2 and B % 2 == 0) else 1
        batches_per_step = B // n_steps
    assert B % batches_per_step == 0, "B must be divisible by batches_per_step"
    Bt = batches_per_step
    n_steps = B // Bt

    cdt = jnp.dtype(compute_dtype)
    x_c = x.astype(cdt)
    A_c = A.astype(cdt)
    w1_c = w1.astype(cdt)
    w2_c = w2.astype(cdt)
    b1_2d = b1.reshape(1, H1).astype(jnp.float32)
    b2_2d = b2.reshape(1, F).astype(jnp.float32)

    # VMEM budget from the actual block footprint (double-buffered blocks +
    # scratch + headroom), clamped to v7x's 64 MiB so one setting is portable.
    csz = cdt.itemsize
    block_bytes = (Bt * V * F * csz + V * V * csz + F * H1 * csz + H1 * 4
                   + H1 * F * csz + F * 4 + Bt * V * V * 4 + Bt * V * F * 4)
    scratch_bytes = Bt * V * H1 * csz
    vmem_limit = int(min(max(4 * block_bytes + scratch_bytes, 8 * 1024 * 1024),
                         64 * 1024 * 1024))

    grid_spec = pltpu.PrefetchScalarGridSpec(
        num_scalar_prefetch=0,
        grid=(n_steps,),
        in_specs=[
            pl.BlockSpec((Bt, V, F), lambda g: (g, 0, 0)),   # x, per step
            # Grid-invariant operands: constant index_map => fetched once.
            pl.BlockSpec((V, V), lambda g: (0, 0)),          # A
            pl.BlockSpec((F, H1), lambda g: (0, 0)),         # W1
            pl.BlockSpec((1, H1), lambda g: (0, 0)),         # b1
            pl.BlockSpec((H1, F), lambda g: (0, 0)),         # W2
            pl.BlockSpec((1, F), lambda g: (0, 0)),          # b2
        ],
        out_specs=[
            pl.BlockSpec((Bt, V, V), lambda g: (g, 0, 0)),   # rec_A
            pl.BlockSpec((Bt, V, F), lambda g: (g, 0, 0)),   # rec_real
        ],
        scratch_shapes=[pltpu.VMEM((Bt * V, H1), cdt)],      # embedding H
    )

    return pl.pallas_call(
        _dominant_kernel,
        out_shape=(
            jax.ShapeDtypeStruct((B, V, V), jnp.float32),
            jax.ShapeDtypeStruct((B, V, F), jnp.float32),
        ),
        grid_spec=grid_spec,
        compiler_params=pltpu.CompilerParams(
            dimension_semantics=("parallel",),
            vmem_limit_bytes=vmem_limit),
    )(x_c, A_c, w1_c, b1_2d, w2_c, b2_2d)


def _reference(data, A, w1, b1, w2, b2, compute_dtype=jnp.float32):
    """Pure-JAX reference with the same operand-cast points as the kernel."""
    cdt = jnp.dtype(compute_dtype)
    x = data[:, -1].astype(cdt)
    A_c = A.astype(cdt)
    seq = jnp.einsum("bvf,fh->bvh", x, w1.astype(cdt),
                     preferred_element_type=jnp.float32) + b1.astype(jnp.float32)
    h = jnp.tanh(jnp.einsum("vw,bwh->bvh", A_c, seq.astype(cdt),
                            preferred_element_type=jnp.float32))
    h_c = h.astype(cdt)
    rec_A = jnp.einsum("bvh,bwh->bvw", h_c, h_c,
                       preferred_element_type=jnp.float32)
    dec = jnp.einsum("bvh,hf->bvf", h_c, w2.astype(cdt),
                     preferred_element_type=jnp.float32) + b2.astype(jnp.float32)
    rec_real = jnp.tanh(jnp.einsum("vw,bwf->bvf", A_c, dec.astype(cdt),
                                   preferred_element_type=jnp.float32))
    return rec_A, rec_real


if __name__ == "__main__":
    # opt: num_adj=V, num_feature=F, hidden1=H1 (hidden2 unused in forward)
    B, T, V, F, H1 = 2, 3, 16, 32, 16

    key = jax.random.PRNGKey(0)
    k_data, k_a, k_w1, k_b1, k_w2, k_b2 = jax.random.split(key, 6)

    data = jax.random.normal(k_data, (B, T, V, F), dtype=jnp.float32)
    A = jax.random.uniform(k_a, (V, V), dtype=jnp.float32)

    # Conv1d(kernel=1) weights stored transposed so the kernel computes X @ W.
    w1 = jax.random.normal(k_w1, (F, H1), dtype=jnp.float32) * 0.1
    b1 = jax.random.normal(k_b1, (H1,), dtype=jnp.float32) * 0.1
    w2 = jax.random.normal(k_w2, (H1, F), dtype=jnp.float32) * 0.1
    b2 = jax.random.normal(k_b2, (F,), dtype=jnp.float32) * 0.1

    # f32 path — exact check against the pure-JAX reference.
    rec_A, rec_real = dominant_forward(data, A, w1, b1, w2, b2)
    jax.block_until_ready((rec_A, rec_real))
    ref_A, ref_real = _reference(data, A, w1, b1, w2, b2)
    assert jnp.allclose(rec_A, ref_A, atol=1e-5, rtol=1e-5)
    assert jnp.allclose(rec_real, ref_real, atol=1e-5, rtol=1e-5)

    # bf16 MXU-operand path (native MXU dtype on v6e/v7x), f32 accumulation,
    # checked against a reference that casts at the same points.
    rec_A_bf, rec_real_bf = dominant_forward(data, A, w1, b1, w2, b2,
                                             compute_dtype=jnp.bfloat16)
    jax.block_until_ready((rec_A_bf, rec_real_bf))
    ref_A_bf, ref_real_bf = _reference(data, A, w1, b1, w2, b2,
                                       compute_dtype=jnp.bfloat16)
    assert jnp.allclose(rec_A_bf, ref_A_bf, atol=5e-2, rtol=5e-2)
    assert jnp.allclose(rec_real_bf, ref_real_bf, atol=5e-2, rtol=5e-2)

    print("KERNEL_OK")
</pallas_src>

<mosaic_0001>
module attributes {stable_mosaic.version = 11 : i64} {
  func.func @_dominant_kernel(%arg0: i32, %arg1: memref<1x16x32xf32, #tpu.memory_space<vmem>>, %arg2: memref<16x16xf32, #tpu.memory_space<vmem>>, %arg3: memref<32x16xf32, #tpu.memory_space<vmem>>, %arg4: memref<1x16xf32, #tpu.memory_space<vmem>>, %arg5: memref<16x32xf32, #tpu.memory_space<vmem>>, %arg6: memref<1x32xf32, #tpu.memory_space<vmem>>, %arg7: memref<1x16x16xf32, #tpu.memory_space<vmem>>, %arg8: memref<1x16x32xf32, #tpu.memory_space<vmem>>, %arg9: memref<16x16xf32, #tpu.memory_space<vmem>>) attributes {dimension_semantics = [#tpu.dimension_semantics<parallel>], iteration_bounds = array<i64: 2>, scalar_prefetch = 0 : i64, scratch_operands = 1 : i64, tpu.core_type = #tpu.core_type<tc>, window_params = [{transform_indices = @transform_0, window_bounds = array<i64: 1, 16, 32>}, {pipeline_mode = #tpu.pipeline_mode<synchronous>, transform_indices = @transform_1, window_bounds = array<i64: 16, 16>}, {pipeline_mode = #tpu.pipeline_mode<synchronous>, transform_indices = @transform_2, window_bounds = array<i64: 32, 16>}, {pipeline_mode = #tpu.pipeline_mode<synchronous>, transform_indices = @transform_3, window_bounds = array<i64: 1, 16>}, {pipeline_mode = #tpu.pipeline_mode<synchronous>, transform_indices = @transform_4, window_bounds = array<i64: 16, 32>}, {pipeline_mode = #tpu.pipeline_mode<synchronous>, transform_indices = @transform_5, window_bounds = array<i64: 1, 32>}, {transform_indices = @transform_6, window_bounds = array<i64: 1, 16, 16>}, {transform_indices = @transform_7, window_bounds = array<i64: 1, 16, 32>}]} {
    %c0 = arith.constant 0 : index
    %c0_0 = arith.constant 0 : index
    %0 = vector.load %arg2[%c0, %c0_0] : memref<16x16xf32, #tpu.memory_space<vmem>>, vector<16x16xf32>
    %c0_1 = arith.constant 0 : index
    %c0_2 = arith.constant 0 : index
    %c0_3 = arith.constant 0 : index
    %1 = vector.load %arg1[%c0_1, %c0_2, %c0_3] : memref<1x16x32xf32, #tpu.memory_space<vmem>>, vector<1x16x32xf32>
    %2 = vector.shape_cast %1 : vector<1x16x32xf32> to vector<16x32xf32>
    %c0_4 = arith.constant 0 : index
    %c0_5 = arith.constant 0 : index
    %3 = vector.load %arg3[%c0_4, %c0_5] : memref<32x16xf32, #tpu.memory_space<vmem>>, vector<32x16xf32>
    %cst = arith.constant dense<0.000000e+00> : vector<16x16xf32>
    %4 = tpu.matmul %2, %3, %cst {dimension_numbers = #tpu.dot_dimension_numbers<[1], [0], [0], [1], [0, 0, 1, 1], [], []>} : vector<16x32xf32>, vector<32x16xf32>, vector<16x16xf32> -> vector<16x16xf32>
    %c0_6 = arith.constant 0 : index
    %c0_7 = arith.constant 0 : index
    %5 = vector.load %arg4[%c0_6, %c0_7] : memref<1x16xf32, #tpu.memory_space<vmem>>, vector<1x16xf32>
    %6 = vector.broadcast %5 : vector<1x16xf32> to vector<16x16xf32>
    %7 = arith.addf %4, %6 : vector<16x16xf32>
    %cst_8 = arith.constant dense<0.000000e+00> : vector<16x16xf32>
    %8 = tpu.matmul %0, %7, %cst_8 {dimension_numbers = #tpu.dot_dimension_numbers<[1], [0], [0], [1], [0, 0, 1, 1], [], []>} : vector<16x16xf32>, vector<16x16xf32>, vector<16x16xf32> -> vector<16x16xf32>
    %9 = math.tanh %8 : vector<16x16xf32>
    %c0_9 = arith.constant 0 : index
    %c0_10 = arith.constant 0 : index
    %10 = vector.load %arg9[%c0_9, %c0_10] : memref<16x16xf32, #tpu.memory_space<vmem>>, vector<16x16xf32>
    tpu.vector_store %arg9[%c0_9, %c0_10], %9 {strides = array<i32>} : memref<16x16xf32, #tpu.memory_space<vmem>>, vector<16x16xf32>,
    %cst_11 = arith.constant dense<0.000000e+00> : vector<16x16xf32>
    %11 = tpu.matmul %9, %9, %cst_11 {dimension_numbers = #tpu.dot_dimension_numbers<[1], [1], [0], [0], [0, 0, 1, 0], [], []>} : vector<16x16xf32>, vector<16x16xf32>, vector<16x16xf32> -> vector<16x16xf32>
    %c0_12 = arith.constant 0 : index
    %c0_13 = arith.constant 0 : index
    %c0_14 = arith.constant 0 : index
    %12 = vector.load %arg7[%c0_12, %c0_13, %c0_14] : memref<1x16x16xf32, #tpu.memory_space<vmem>>, vector<1x16x16xf32>
    %13 = vector.shape_cast %12 : vector<1x16x16xf32> to vector<16x16xf32>
    %14 = vector.shape_cast %11 : vector<16x16xf32> to vector<1x16x16xf32>
    tpu.vector_store %arg7[%c0_12, %c0_13, %c0_14], %14 {strides = array<i32>} : memref<1x16x16xf32, #tpu.memory_space<vmem>>, vector<1x16x16xf32>,
    %c0_15 = arith.constant 0 : index
    %c0_16 = arith.constant 0 : index
    %15 = vector.load %arg9[%c0_15, %c0_16] : memref<16x16xf32, #tpu.memory_space<vmem>>, vector<16x16xf32>
    %c0_17 = arith.constant 0 : index
    %c0_18 = arith.constant 0 : index
    %16 = vector.load %arg5[%c0_17, %c0_18] : memref<16x32xf32, #tpu.memory_space<vmem>>, vector<16x32xf32>
    %cst_19 = arith.constant dense<0.000000e+00> : vector<16x32xf32>
    %17 = tpu.matmul %15, %16, %cst_19 {dimension_numbers = #tpu.dot_dimension_numbers<[1], [0], [0], [1], [0, 0, 1, 1], [], []>} : vector<16x16xf32>, vector<16x32xf32>, vector<16x32xf32> -> vector<16x32xf32>
    %c0_20 = arith.constant 0 : index
    %c0_21 = arith.constant 0 : index
    %18 = vector.load %arg6[%c0_20, %c0_21] : memref<1x32xf32, #tpu.memory_space<vmem>>, vector<1x32xf32>
    %19 = vector.broadcast %18 : vector<1x32xf32> to vector<16x32xf32>
    %20 = arith.addf %17, %19 : vector<16x32xf32>
    %cst_22 = arith.constant dense<0.000000e+00> : vector<16x32xf32>
    %21 = tpu.matmul %0, %20, %cst_22 {dimension_numbers = #tpu.dot_dimension_numbers<[1], [0], [0], [1], [0, 0, 1, 1], [], []>} : vector<16x16xf32>, vector<16x32xf32>, vector<16x32xf32> -> vector<16x32xf32>
    %22 = math.tanh %21 : vector<16x32xf32>
    %c0_23 = arith.constant 0 : index
    %c0_24 = arith.constant 0 : index
    %c0_25 = arith.constant 0 : index
    %23 = vector.load %arg8[%c0_23, %c0_24, %c0_25] : memref<1x16x32xf32, #tpu.memory_space<vmem>>, vector<1x16x32xf32>
    %24 = vector.shape_cast %23 : vector<1x16x32xf32> to vector<16x32xf32>
    %25 = vector.shape_cast %22 : vector<16x32xf32> to vector<1x16x32xf32>
    tpu.vector_store %arg8[%c0_23, %c0_24, %c0_25], %25 {strides = array<i32>} : memref<1x16x32xf32, #tpu.memory_space<vmem>>, vector<1x16x32xf32>,
    return
  }
  func.func @transform_0(%arg0: i32) -> (i32, i32, i32) {
    %c0_i32 = arith.constant 0 : i32
    %c0_i32_0 = arith.constant 0 : i32
    %c0_i32_1 = arith.constant 0 : i32
    return %arg0, %c0_i32, %c0_i32_0 : i32, i32, i32
  }
  func.func @transform_1(%arg0: i32) -> (i32, i32) {
    %c0_i32 = arith.constant 0 : i32
    %c0_i32_0 = arith.constant 0 : i32
    %c0_i32_1 = arith.constant 0 : i32
    return %c0_i32, %c0_i32_0 : i32, i32
  }
  func.func @transform_2(%arg0: i32) -> (i32, i32) {
    %c0_i32 = arith.constant 0 : i32
    %c0_i32_0 = arith.constant 0 : i32
    %c0_i32_1 = arith.constant 0 : i32
    return %c0_i32, %c0_i32_0 : i32, i32
  }
  func.func @transform_3(%arg0: i32) -> (i32, i32) {
    %c0_i32 = arith.constant 0 : i32
    %c0_i32_0 = arith.constant 0 : i32
    %c0_i32_1 = arith.constant 0 : i32
    return %c0_i32, %c0_i32_0 : i32, i32
  }
  func.func @transform_4(%arg0: i32) -> (i32, i32) {
    %c0_i32 = arith.constant 0 : i32
    %c0_i32_0 = arith.constant 0 : i32
    %c0_i32_1 = arith.constant 0 : i32
    return %c0_i32, %c0_i32_0 : i32, i32
  }
  func.func @transform_5(%arg0: i32) -> (i32, i32) {
    %c0_i32 = arith.constant 0 : i32
    %c0_i32_0 = arith.constant 0 : i32
    %c0_i32_1 = arith.constant 0 : i32
    return %c0_i32, %c0_i32_0 : i32, i32
  }
  func.func @transform_6(%arg0: i32) -> (i32, i32, i32) {
    %c0_i32 = arith.constant 0 : i32
    %c0_i32_0 = arith.constant 0 : i32
    %c0_i32_1 = arith.constant 0 : i32
    return %arg0, %c0_i32, %c0_i32_0 : i32, i32, i32
  }
  func.func @transform_7(%arg0: i32) -> (i32, i32, i32) {
    %c0_i32 = arith.constant 0 : i32
    %c0_i32_0 = arith.constant 0 : i32
    %c0_i32_1 = arith.constant 0 : i32
    return %arg0, %c0_i32, %c0_i32_0 : i32, i32, i32
  }
}

</mosaic_0001>

<bundles_post_ra>
// kernel: tpu_custom_call.1
= control target key start
LH: loop header
LB: loop body
LE: loop exit
PB: predicated region body
PF: predicated region fallthrough
CT: control target
= control target key end

     0   :  { %13 = vsyncpa [#allocation4], 0  ;;  %s1422_s0 = inlined_call_operand.vmem [shape: f32[2,16,32], index: 0, kind: input, shape index: {}]   ;;  %s1423_s1 = inlined_call_operand.vmem [shape: f32[16,16], index: 1, kind: input, shape index: {}]   ;;  %s1424_s2 = inlined_call_operand.vmem [shape: f32[32,16], index: 2, kind: input, shape index: {}]   ;;  %s1425_s3 = inlined_call_operand.vmem [shape: f32[1,16], index: 3, kind: input, shape index: {}]   ;;  %s1426_s4 = inlined_call_operand.hbm [shape: f32[16,32], index: 4, kind: input, shape index: {}]   ;;  %s1427_s5 = inlined_call_operand.vmem [shape: f32[1,32], index: 5, kind: input, shape index: {}]   ;;  %s1428_s6 = inlined_call_operand.hbm [shape: f32[2,16,16], index: 6, kind: output, shape index: {0}]   ;;  %s1429_s7 = inlined_call_operand.hbm [shape: f32[2,16,32], index: 7, kind: output, shape index: {1}]  }
   0x1   :  { %14 = vsyncpa [#allocation5], 0 }
   0x2   :  { %16 = vsyncpa [#allocation5 + $0x1], 0 }
   0x3   :  { %17 = vsyncpa [#allocation8], 0 }
   0x4   :  { %19 = vsyncpa [#allocation8 + $0x1], 0  ;;  %s1213_s24 = smov 0   ;;  %s1215_s25 = smov 0  }
   0x5   :  { %s1217_s26 = smov 0   ;;  %s1219_s27 = smov 0  }
   0x6 LB: > { %s1234_s28 = sadd.s32 4294967295, %s1164_s27   ;;  %s881_s29 = sadd.s32 4294967294, %s1164_s27   ;;  %s1164_s27 = sphi %s1219_s27, %s1439_s27   ;;  %s1160_s26 = sphi %s1217_s26, %s1438_s26   ;;  %s1156_s25 = sphi %s1215_s25, %s1437_s25   ;;  %s1152_s24 = sphi %s1213_s24, %s1436_s24  }
   0x7   : > { %s1238_s30 = sadd.s32 1, %s1164_s27   ;;  %s163_s8 = sadd.s32 1, %s1160_s26 }
   0x8   : > { %s160_s9 = ssub.s32 %s1164_s27, %s1238_s30  ;;  %p173_p0 = scmp.ne.s32.totalorder %s1160_s26, %s1156_s25 }
   0x9   : > { %p161_p1 = scmp.eq.s32.totalorder %s160_s9, 0  ;;  %p174_p2 = scmp.eq.s32.totalorder %s1234_s28, 1 }
   0xa   : > { %p179_p3 = scmp.ne.s32.totalorder %s1156_s25, %s1152_s24  ;;  %p180_p4 = scmp.eq.s32.totalorder %s881_s29, 1 }
   0xb   : > { %s1249_s10 = scalar_select %p161_p1, %s1160_s26, %s163_s8  }
   0xc   : > { %p1251_p5 = por %p174_p2, %p173_p0  ;;  %p1255_p6 = por %p180_p4, %p179_p3 }
   0xd   : > { %p882_p7 = scmp.ge.s32.totalorder %s1164_s27, 1  ;;  %p213_p8 = scmp.lt.s32.totalorder %s1164_s27, 3 }
   0xe   : > { %s1432_s12 = scalar_select %p1255_p6, 1, 0 }
   0xf   : > { %p996_p9 = scmp.eq.s32.totalorder %s1234_s28, 0  ;;  %p1262_p10 = pnand %p882_p7, %p213_p8 }
  0x10   : > { %s1166_s14 = smov [#allocation3]  }
  0x11   : > { %s234_s15 = sshll.u32 %s1166_s14, 4  ;;  %p985_p11 = pneg %p1262_p10  ;;  %s235_s15 = int_to_ptr.vmem [resolvable:$true] %s234_s15 }
  0x12   : > { %s1055_s16 = scalar_lea.vmem %s235_s15, 256  ;;  %p1063_p3 = scmp.lt.s32.totalorder %s235_s15, %s235_s15 }
  0x13   : > { %p986_p12 = pnand %p996_p9, %p985_p11  ;;  %p1056_p0 = scmp.ne.s32.totalorder %s235_s15, %s1055_s16 }
  0x14   : > { %p1064_p4 = scmp.lt.s32.totalorder %s1055_s16, %s1055_s16 }
  0x15   : > { %p1046_p13 = pneg %p986_p12 }
  0x16   : > { %p1065_p6 = por %p1064_p4, %p1063_p3 }
  0x17   : > { %p1058_p1 = pnand %p1056_p0, %p1046_p13 }
  0x19   : > { %p1059_p2 = pneg %p1058_p1 }
  0x1b   : > { %p1066_p7 = pnand %p1065_p6, %p1059_p2 }
  0x1d   : > { %1069 = shalt.err (!%p1066_p7)
}
  0x1e   : > { %s1167_s17 = smov 128   ;;  %s1168_s18 = smov 8  }
  0x1f   : > { %988 = dma.hbm_to_vmem [thread:$0]  (!%p986_p12), %s1426_s4, 256, %s235_s15, [#allocation4], %s1167_s17, %s1167_s17, %s1168_s18  }
  0x20   : > { %261 = sbr.rel (%p1262_p10) target bundleno = 885 (0x375), region = 44 }
  0x25   : > { %1139 = dma.done.wait (%p996_p9), [#allocation4], 256  }
  0x26   : > { %1141 = vsyncadd (%p996_p9), [#allocation4], 4294967040  ;;  %p298_p8 = scmp.lt.s32.totalorder %s1234_s28, 1  ;;  %vm318_vm0 = vcmask 261120   ;;  %v310_v0 = vld [vmem:[%s1424_s2 + $0x18] sm:$0xff]  ;;  %v309_v1 = vld [vmem:[%s1424_s2 + $0x10] sm:$0xff] }
  0x27   : > { %938 = vmatprep.subr.mxu0 %v310_v0  ;;  %v308_v3 = vld [vmem:[%s1424_s2 + $0x8] sm:$0xff]  ;;  %v307_v4 = vld [vmem:[%s1424_s2] sm:$0xff]  ;;  %vm400_vm1 = vcmask 130048   ;;  %v572_v13 = vld [vmem:[#allocation3 + $0x8] sm:$0xff]  ;;  %s1321_s9 = sand.u32 1, %s1156_s25   ;;  %s1430_s18 = sshll.u32 %s1234_s28, 8 }
  0x28   : > { %s299_s21 = scalar_select %p298_p8, %s1234_s28, 1  ;;  %939 = vmatpush3.msra.mxu0 %v310_v0  ;;  %v303_v6 = vld [vmem:[%s1423_s1] sm:$0xff]  ;;  %v304_v12 = vld [vmem:[%s1423_s1 + $0x8] sm:$0xff]  ;;  %v571_v14 = vld [vmem:[#allocation3] sm:$0xff] }
  0x29   : > { %940 = vmatprep.subr.mxu0 %v309_v1  ;;  %953 = vmatprep.mubr.msk.f32.mxu1 %vm400_vm1, %v303_v6  ;;  %v891_v7 = vld [vmem:[%s1425_s3] ss:$0 sm:$0xff]  ;;  %s887_s14 = sshll.u32 %s1321_s9, 4  ;;  %s1169_s29 = smov [#allocation6]  }
  0x2a   : > { %s913_s22 = sshll.u32 %s299_s21, 4  ;;  %941 = vmatpush3.msra.mxu0 %v309_v1  ;;  %s290_s13 = scalar_lea.vmem [#allocation6], %s887_s14  ;;  %v900_v22 = vld [vmem:[%s1427_s5] ss:$0 sm:$0xff] }
  0x2b   : > { %s302_s8 = scalar_lea.vmem %s1422_s0, %s913_s22  ;;  %942 = vmatprep.subr.mxu0 %v308_v3  ;;  %s759_s17 = sshll.u32 %s290_s13, 4  ;;  %s1332_s17 = int_to_ptr.vmem [resolvable:$true] %s759_s17 }
  0x2c   : > { %v305_v2 = vld [vmem:[%s302_s8] sm:$0xff]  ;;  %943 = vmatpush3.msra.mxu0 %v308_v3  ;;  %v306_v5 = vld [vmem:[%s302_s8 + $0x8] sm:$0xff]  ;;  %s1340_s21 = scalar_lea.hbm %s1428_s6, %s1430_s18  ;;  %s741_s22 = scalar_lea.sflag [#allocation5], %s1321_s9 }
  0x2d   : > { %946 = vmatprep.mubr.msk.f32.mxu0 %vm318_vm0, %v305_v2  ;;  %944 = vmatprep.subr.mxu0 %v307_v4  ;;  %s1070_s23 = scalar_lea.vmem %s1332_s17, 256  ;;  %s1074_s8 = sshll.u32 %s1169_s29, 4  ;;  %s1075_s8 = int_to_ptr.vmem [resolvable:$false] %s1074_s8 }
  0x2e   : > { %945 = vmatpush3.msra.mxu0 %v307_v4  ;;  %p1071_p6 = scmp.ne.s32.totalorder %s1332_s17, %s1070_s23  ;;  %p1077_p11 = scmp.lt.s32.totalorder %s1332_s17, %s1075_s8 }
  0x2f   : > { %947 = vmatmul.mubr.msk.f32.vlgmr.msra.gmra.mxu0 %vm318_vm0, %v306_v5  ;;  %963 = vmatprep.subr.mxu0 %v572_v13 }
  0x30   : > { %964 = vmatpush3.msra.mxu0 %v572_v13  ;;  %p1072_p9 = pnand %p1071_p6, %p1251_p5 }
  0x31   : > { %965 = vmatprep.subr.mxu0 %v571_v14 }
  0x32   : > { %966 = vmatpush3.msra.mxu0 %v571_v14  ;;  %p1073_p10 = pneg %p1072_p9 }
  0xef   : > { %v948_v8 = vpop.f32.mrf.mxu0 }
  0xf0   : > { %v397_v9 = vadd.f32 %v948_v8, %v891_v7 }
  0xf1   : > { %v391_v10 = vpop.f32.mrf.mxu0 }
  0xf2   : > { %v392_v11 = vadd.f32 %v891_v7, %v391_v10  ;;  %949 = vmatprep.subr.mxu1 %v397_v9 }
  0xf3   : > { %950 = vmatpush3.msra.mxu1 %v397_v9 }
  0xf4   : > { %951 = vmatprep.subr.mxu1 %v392_v11 }
  0xf5   : > { %952 = vmatpush3.msra.mxu1 %v392_v11 }
  0xf6   : > { %954 = vmatmul.mubr.msk.f32.vlgmr.msra.gmra.mxu1 %vm400_vm1, %v304_v12 }
 0x1b6   : > { %v955_v15 = vpop.f32.mrf.mxu1 }
 0x1b7   : > { %1036 = vtanh.f32 %v955_v15 }
 0x1b8   : > { %v473_v16 = vpop.f32.mrf.mxu1 }
 0x1b9   : > { %1038 = vtanh.f32 %v473_v16 }
 0x1c4   : > { %v1037_v17 = vpop.eup %1036 }
 0x1c5   : > { %485 = vst.msk [vmem:[#allocation2 + $0x8] sm:$0xff] %vm400_vm1, %v1037_v17  ;;  %956 = vmatprep.subr.msk.mxu1 %vm400_vm1, %v1037_v17 }
 0x1c6   : > { %v1039_v18 = vpop.eup %1038  ;;  %957 = vmatpush3.xpose.msk.msra.mxu1 %vm400_vm1, %v1037_v17 }
 0x1c7   : > { %484 = vst.msk [vmem:[#allocation2] sm:$0xff] %vm400_vm1, %v1039_v18  ;;  %958 = vmatprep.subr.msk.mxu1 %vm400_vm1, %v1039_v18  ;;  %960 = vmatprep.mubr.msk.f32.mxu1 %vm400_vm1, %v1039_v18 }
 0x1ca   : > { %959 = vmatpush3.xpose.msk.msra.mxu1 %vm400_vm1, %v1039_v18 }
 0x1cc   : > { %v570_v20 = vld [vmem:[#allocation2 + $0x8] sm:$0xff] }
 0x1cd   : > { %961 = vmatmul.mubr.msk.f32.vlgmr.msra.gmra.mxu1 %vm400_vm1, %v1037_v17 }
 0x1ce   : > { %v569_v19 = vld [vmem:[#allocation2] sm:$0xff] }
 0x1cf   : > { %967 = vmatprep.mubr.msk.f32.mxu0 %vm400_vm1, %v569_v19 }
 0x1d0   : > { %968 = vmatmul.mubr.msk.f32.vlgmr.msra.gmra.mxu0 %vm400_vm1, %v570_v20 }
 0x1d1   : > { %974 = vmatprep.mubr.msk.f32.mxu0 %vm400_vm1, %v303_v6 }
 0x28d   : > { %v962_v21 = vpop.f32.mrf.mxu1 }
 0x28e   : > { %568 = vst.msk [vmem:[%s290_s13 + $0x8] sm:$0xff] %vm400_vm1, %v962_v21 }
 0x28f   : > { %v558_v23 = vpop.f32.mrf.mxu1 }
 0x290   : > { %567 = vst.msk [vmem:[%s290_s13] sm:$0xff] %vm400_vm1, %v558_v23  ;;  %v969_v24 = vpop.f32.mrf.mxu0  ;;  %s1076_s13 = scalar_lea.vmem %s1075_s8, 512 }
 0x291   : > { %v658_v25 = vadd.f32 %v969_v24, %v900_v22  ;;  %p1078_p12 = scmp.lt.s32.totalorder %s1076_s13, %s1070_s23 }
 0x292   : > { %v652_v26 = vpop.f32.mrf.mxu0 }
 0x293   : > { %v653_v27 = vadd.f32 %v900_v22, %v652_v26  ;;  %970 = vmatprep.subr.mxu0 %v658_v25  ;;  %p1079_p13 = por %p1078_p12, %p1077_p11 }
 0x294   : > { %971 = vmatpush3.msra.mxu0 %v658_v25 }
 0x295   : > { %972 = vmatprep.subr.mxu0 %v653_v27  ;;  %p1080_p0 = pnand %p1079_p13, %p1073_p10 }
 0x296   : > { %973 = vmatpush3.msra.mxu0 %v653_v27 }
 0x297   : > { %975 = vmatmul.mubr.msk.f32.vlgmr.msra.gmra.mxu0 %vm400_vm1, %v304_v12 }
 0x298   : > { %1083 = shalt.err (!%p1080_p0)
}
 0x299   : > { %s1084_s15 = scalar_lea.hbm %s1340_s21, 256  ;;  %s1088_s20 = scalar_lea.hbm %s1428_s6, 512 }
 0x29a   : > { %p1085_p1 = scmp.ne.s32.totalorder %s1340_s21, %s1084_s15  ;;  %p1089_p4 = scmp.lt.s32.totalorder %s1340_s21, %s1428_s6 }
 0x29b   : > { %p1090_p7 = scmp.lt.s32.totalorder %s1088_s20, %s1084_s15 }
 0x29c   : > { %p1086_p2 = pnand %p1085_p1, %p1251_p5 }
 0x29d   : > { %p1091_p8 = por %p1090_p7, %p1089_p4 }
 0x29e   : > { %p1087_p3 = pneg %p1086_p2 }
 0x2a0   : > { %p1092_p6 = pnand %p1091_p8, %p1087_p3 }
 0x2a2   : > { %1095 = shalt.err (!%p1092_p6)
}
 0x2a3   : > { %s1170_s23 = smov 128   ;;  %s1171_s8 = smov 8  }
 0x2a4   : > { %981 = dma.vmem_to_hbm [thread:$0]  (%p1251_p5), %s1332_s17, 256, %s1340_s21, %s741_s22, %s1170_s23, %s1170_s23, %s1171_s8  }
 0x2a5   : > { %s297_s18 = scalar_lea.vmem [#allocation7], %s887_s14  ;;  %s1434_s15 = sshll.u32 %s1234_s28, 8 }
 0x2a6   : > { %s775_s13 = sshll.u32 %s297_s18, 4  ;;  %s1378_s17 = scalar_lea.hbm %s1429_s7, %s1434_s15  ;;  %s1370_s13 = int_to_ptr.vmem [resolvable:$true] %s775_s13 }
 0x2a7   : > { %s746_s21 = scalar_lea.sflag [#allocation8], %s1321_s9  ;;  %s1096_s14 = scalar_lea.vmem %s1370_s13, 256 }
 0x2a8   : > { %p1097_p9 = scmp.ne.s32.totalorder %s1370_s13, %s1096_s14  ;;  %s1172_s22 = smov [#allocation7]  }
 0x2a9   : > { %s1100_s20 = sshll.u32 %s1172_s22, 4  ;;  %s1101_s20 = int_to_ptr.vmem [resolvable:$false] %s1100_s20 }
 0x2aa   : > { %p1098_p10 = pnand %p1097_p9, %p1251_p5  ;;  %s1102_s29 = scalar_lea.vmem %s1101_s20, 512 }
 0x2ab   : > { %p1103_p12 = scmp.lt.s32.totalorder %s1370_s13, %s1101_s20  ;;  %p1104_p13 = scmp.lt.s32.totalorder %s1102_s29, %s1096_s14 }
 0x2ac   : > { %p1099_p11 = pneg %p1098_p10 }
 0x2ad   : > { %p1105_p0 = por %p1104_p13, %p1103_p12 }
 0x2af   : > { %p1106_p1 = pnand %p1105_p0, %p1099_p11 }
 0x357   : > { %v976_v28 = vpop.f32.mrf.mxu0 }
 0x358   : > { %1040 = vtanh.f32 %v976_v28 }
 0x359   : > { %v727_v29 = vpop.f32.mrf.mxu0 }
 0x35a   : > { %1042 = vtanh.f32 %v727_v29 }
 0x365   : > { %v1041_v30 = vpop.eup %1040 }
 0x366   : > { %739 = vst.msk [vmem:[%s297_s18 + $0x8] sm:$0xff] %vm318_vm0, %v1041_v30 }
 0x367   : > { %v1043_v31 = vpop.eup %1042 }
 0x368   : > { %738 = vst.msk [vmem:[%s297_s18] sm:$0xff] %vm318_vm0, %v1043_v31 }
 0x369   : > { %1109 = shalt.err (!%p1106_p1)
}
 0x36a   : > { %s1110_s28 = scalar_lea.hbm %s1378_s17, 256  ;;  %s1114_s15 = scalar_lea.hbm %s1429_s7, 512 }
 0x36b   : > { %p1111_p2 = scmp.ne.s32.totalorder %s1378_s17, %s1110_s28  ;;  %p1115_p7 = scmp.lt.s32.totalorder %s1378_s17, %s1429_s7 }
 0x36c   : > { %p1116_p8 = scmp.lt.s32.totalorder %s1114_s15, %s1110_s28 }
 0x36d   : > { %p1112_p3 = pnand %p1111_p2, %p1251_p5 }
 0x36e   : > { %p1117_p6 = por %p1116_p8, %p1115_p7 }
 0x36f   : > { %p1113_p4 = pneg %p1112_p3 }
 0x371   : > { %p1118_p9 = pnand %p1117_p6, %p1113_p4 }
 0x373   : > { %1121 = shalt.err (!%p1118_p9)
}
 0x374   : > { %982 = dma.vmem_to_hbm [thread:$0]  (%p1251_p5), %s1370_s13, 256, %s1378_s17, %s746_s21, %s1170_s23, %s1170_s23, %s1171_s8  }
 0x375 PF: > { %p998_p10 = scmp.ge.s32.totalorder %s1164_s27, 2  ;;  %s790_s14 = sand.u32 1, %s1152_s24  }
 0x376   : > { %p1435_p11 = scmp.ne.s32.totalorder %s1432_s12, 0  ;;  %s791_s22 = scalar_lea.sflag [#allocation5], %s790_s14 }
 0x378   : > { %p990_p12 = pnand %p998_p10, %p1435_p11 }
 0x37a   : > { %p991_p13 = pneg %p990_p12 }
 0x37c   : > { %1143 = dma.done.wait (%p991_p13), %s791_s22, 256  }
 0x37d   : > { %1145 = vsyncadd (%p991_p13), %s791_s22, 4294967040  ;;  %s800_s20 = scalar_lea.sflag [#allocation8], %s790_s14 }
 0x37e   : > { %1147 = dma.done.wait (%p991_p13), %s800_s20, 256  }
 0x37f   : > { %1149 = vsyncadd (%p991_p13), %s800_s20, 4294967040  ;;  %p22_p5 = scmp.ge.s32.totalorder %s1238_s30, 4   ;;  %s1436_s24 = smov %s1156_s25 }
 0x380   : > { %s1437_s25 = smov %s1160_s26  ;;  %s1438_s26 = smov %s1249_s10 }
 0x381   : > { %s1439_s27 = smov %s1238_s30  ;;  %24 = sbr.rel (!%p22_p5) target bundleno = 6 (0x6), region = 101 }
 0x386   :  { %805 = vsyncpa [#allocation4], 1 }
 0x387   :  { %807 = vsyncpa [#allocation4 + $0x1], 1 }
 0x388   :  { %808 = vsyncpa [#allocation5], 1 }
 0x389   :  { %810 = vsyncpa [#allocation5 + $0x1], 1 }
 0x38a   :  { %811 = vsyncpa [#allocation8], 1 }
 0x38b   :  { %813 = vsyncpa [#allocation8 + $0x1], 1 }

</bundles_post_ra>
